<compile_context>
chip_gen: v5e
topology: v5e:2x2
jax: 0.10.0
libtpu: 0.0.40
codegen_flags: <defaults>
</compile_context>

<pallas_src>
import functools

import jax
import jax.numpy as jnp
from jax.experimental import pallas as pl
from jax.experimental.pallas import tpu as pltpu

_SUB = 16                          # row granularity: sublane-pack friendly for f32 AND bf16
_VMEM_BUDGET = 12 * 1024 * 1024    # bytes for (2x double-buffered inputs + f32 accumulator)


def _round_up(a, b):
    return (a + b - 1) // b * b


def _cdiv(a, b):
    return (a + b - 1) // b


def _bce_sum_kernel(x_ref, z_ref, out_ref, acc_ref, *, smoothing, n_valid_rows,
                    block_rows, n_inner, apply_mask):
    """Per-tile BCE-with-logits, accumulated into a VMEM vector accumulator.

    Grid: (outer 'parallel' core split, inner 'arbitrary' reduction over row tiles).
    The scalar SMEM output (one per outer slice) is written only on the last inner
    step, so steady-state work is VPU/EUP only (no per-step XLU reduce / SMEM RMW).
    """
    p = pl.program_id(0)
    i = pl.program_id(1)

    @pl.when(i == 0)
    def _init():
        acc_ref[...] = jnp.zeros_like(acc_ref)

    x = x_ref[...].astype(jnp.float32)
    z = z_ref[...].astype(jnp.float32)
    if smoothing > 0.0:
        z = jnp.clip(z, smoothing, 1.0 - smoothing)

    # Numerically stable BCE-with-logits (matches torch.nn.BCEWithLogitsLoss):
    loss = jnp.maximum(x, 0.0) - x * z + jnp.log1p(jnp.exp(-jnp.abs(x)))

    if apply_mask:
        # Zero rows that are (a) wrapper zero-padding or (b) a duplicated
        # (index-clamped) tile from rounding the tile count up for the 2-core split.
        t = p * n_inner + i                                   # virtual tile index
        row_ids = t * block_rows + jax.lax.broadcasted_iota(
            jnp.int32, (block_rows, 1), 0)
        loss = jnp.where(row_ids < n_valid_rows, loss, 0.0)

    acc_ref[...] += loss                                      # pure VPU accumulate

    @pl.when(i == pl.num_programs(1) - 1)
    def _finish():
        out_ref[0, 0] = jnp.sum(acc_ref[...])                 # single XLU reduce


def bce_with_logits_loss(probs, gold, *, smoothing: float = 0.0, contrib: float = 1.0,
                         block_rows: int = 512, bf16_targets: bool = True):
    """Mean-reduced BCE-with-logits loss (scalar), computed with a Pallas kernel."""
    assert probs.shape == gold.shape, "probs and gold must have the same shape"

    d = probs.shape[-1]
    x2 = probs.reshape(-1, d)
    z2 = gold.reshape(-1, d)
    if bf16_targets and z2.dtype == jnp.float32:
        # {0,1} / clamped binary targets are exact in bf16; halves the target HBM
        # stream of this bandwidth-bound kernel. Use bf16_targets=False for soft
        # labels that need full f32 precision.
        z2 = z2.astype(jnp.bfloat16)
    n = x2.shape[0]
    numel = n * d

    # ---- choose a large, VMEM-budgeted row tile (last dim = full D, lane dense) ----
    n16 = _round_up(n, _SUB)
    bytes_per_row = d * (2 * x2.dtype.itemsize + 2 * z2.dtype.itemsize + 4)
    budget_rows = max(_SUB, (_VMEM_BUDGET // bytes_per_row) // _SUB * _SUB)
    br = max(_SUB, min(block_rows // _SUB * _SUB, budget_rows, n16))
    # Prefer a tile height that divides the (sublane-rounded) row count so the
    # wrapper avoids materializing a padded copy of the inputs when possible.
    stop = max(_SUB, (br // 4) // _SUB * _SUB)
    for cand in range(br, stop - 1, -_SUB):
        if n16 % cand == 0:
            br = cand
            break
    n_tiles = _cdiv(n, br)
    n_rows_pad = n_tiles * br
    if n_rows_pad != n:
        pad = n_rows_pad - n
        x2 = jnp.pad(x2, ((0, pad), (0, 0)))
        z2 = jnp.pad(z2, ((0, pad), (0, 0)))

    # ---- 2-way outer split so both v7x TensorCores stream concurrently ----
    n_outer = 2 if n_tiles > 1 else 1
    n_inner = _cdiv(n_tiles, n_outer)
    apply_mask = (n_rows_pad != n) or (n_outer * n_inner != n_tiles)

    def row_block(p_, i_):
        # Clamp so a rounded-up virtual tile never DMAs out of bounds; the in-kernel
        # row mask zeroes any duplicated tile's contribution.
        return (jnp.minimum(p_ * n_inner + i_, n_tiles - 1), 0)

    kernel = functools.partial(
        _bce_sum_kernel, smoothing=float(smoothing), n_valid_rows=n,
        block_rows=br, n_inner=n_inner, apply_mask=apply_mask)

    partial_sums = pl.pallas_call(
        kernel,
        out_shape=jax.ShapeDtypeStruct((n_outer, 1), jnp.float32),
        grid_spec=pltpu.PrefetchScalarGridSpec(
            num_scalar_prefetch=0,
            grid=(n_outer, n_inner),
            in_specs=[
                pl.BlockSpec((br, d), row_block),
                pl.BlockSpec((br, d), row_block),
            ],
            out_specs=pl.BlockSpec((1, 1), lambda p_, i_: (p_, 0),
                                   memory_space=pltpu.SMEM),
            scratch_shapes=[pltpu.VMEM((br, d), jnp.float32)],
        ),
        compiler_params=pltpu.CompilerParams(
            dimension_semantics=("parallel", "arbitrary"),
            vmem_limit_bytes=32 * 1024 * 1024,
        ),
    )(x2, z2)

    mean_loss = jnp.sum(partial_sums) / jnp.float32(numel)    # reduction='mean'
    return mean_loss * jnp.float32(contrib)


def bce_loss_module(probs, predactions, gold, *, smoothing: float = 0.0,
                    contrib: float = 1.0, **kw):
    """Mirrors BCELoss.forward (mode='logits'): returns {'loss': ret, 'ce': ret}."""
    ret = bce_with_logits_loss(probs, gold, smoothing=smoothing, contrib=contrib, **kw)
    return {"loss": ret, "ce": ret}


def _reference(probs, gold, smoothing, contrib):
    x = probs.astype(jnp.float32)
    z = gold.astype(jnp.float32)
    if smoothing > 0:
        z = jnp.clip(z, smoothing, 1.0 - smoothing)
    l = jnp.maximum(x, 0.0) - x * z + jnp.log1p(jnp.exp(-jnp.abs(x)))
    return jnp.mean(l) * contrib


if __name__ == "__main__":
    key = jax.random.PRNGKey(0)
    k1, k2, k3, k4, k5, k6 = jax.random.split(key, 6)

    # Case 1: lane-aligned shape, binary targets (exact in bf16), label smoothing.
    B, D = 16, 128
    logits1 = jax.random.normal(k1, (B, D), dtype=jnp.float32)
    gold1 = jax.random.bernoulli(k2, 0.5, (B, D)).astype(jnp.float32)
    out1 = bce_loss_module(logits1, None, gold1, smoothing=0.1, contrib=1.0)
    loss1 = jax.block_until_ready(out1["loss"])
    ref1 = _reference(logits1, gold1, 0.1, 1.0)
    assert jnp.allclose(loss1, ref1, rtol=1e-5, atol=1e-5), (loss1, ref1)

    # Case 2: ragged rows + non-128 feature dim + soft targets (keep f32 targets);
    # exercises wrapper padding and the in-kernel row mask.
    logits2 = jax.random.normal(k3, (2, 5, 100), dtype=jnp.float32)
    gold2 = jax.random.uniform(k4, (2, 5, 100), dtype=jnp.float32)
    out2 = bce_loss_module(logits2, None, gold2, smoothing=0.0, contrib=0.5,
                           bf16_targets=False)
    loss2 = jax.block_until_ready(out2["loss"])
    ref2 = _reference(logits2, gold2, 0.0, 0.5)
    assert jnp.allclose(loss2, ref2, rtol=1e-5, atol=1e-5), (loss2, ref2)

    # Case 3: multiple row tiles with an odd tile count -> exercises the 2-way
    # "parallel" core split and the clamped duplicate tile (small block_rows is
    # forced only so the tiny demo hits that path).
    logits3 = jax.random.normal(k5, (48, 128), dtype=jnp.float32)
    gold3 = jax.random.bernoulli(k6, 0.5, (48, 128)).astype(jnp.float32)
    out3 = bce_loss_module(logits3, None, gold3, smoothing=0.05, contrib=2.0,
                           block_rows=16)
    loss3 = jax.block_until_ready(out3["loss"])
    ref3 = _reference(logits3, gold3, 0.05, 2.0)
    assert jnp.allclose(loss3, ref3, rtol=1e-5, atol=1e-5), (loss3, ref3)

    print("KERNEL_OK")
</pallas_src>

<mosaic_0001>
module attributes {stable_mosaic.version = 11 : i64} {
  func.func @_bce_sum_kernel(%arg0: i32, %arg1: i32, %arg2: memref<16x128xf32, #tpu.memory_space<vmem>>, %arg3: memref<16x128xbf16, #tpu.memory_space<vmem>>, %arg4: memref<1x1xf32, #tpu.memory_space<smem>>, %arg5: memref<16x128xf32, #tpu.memory_space<vmem>>) attributes {dimension_semantics = [#tpu.dimension_semantics<parallel>, #tpu.dimension_semantics<arbitrary>], iteration_bounds = array<i64: 1, 1>, scalar_prefetch = 0 : i64, scratch_operands = 1 : i64, tpu.core_type = #tpu.core_type<tc>, window_params = [{transform_indices = @transform_0, window_bounds = array<i64: 16, 128>}, {transform_indices = @transform_1, window_bounds = array<i64: 16, 128>}, {transform_indices = @transform_2, window_bounds = array<i64: 1, 1>}]} {
    %c0_i32 = arith.constant 0 : i32
    %0 = arith.cmpi eq, %arg1, %c0_i32 : i32
    %1 = arith.extui %0 : i1 to i32
    %c0_i32_0 = arith.constant 0 : i32
    %2 = arith.cmpi ne, %1, %c0_i32_0 : i32
    scf.if %2 {
      %cst_13 = arith.constant 0.000000e+00 : f32
      %26 = vector.broadcast %cst_13 : f32 to vector<16x128xf32>
      %c0_14 = arith.constant 0 : index
      %c0_15 = arith.constant 0 : index
      %27 = vector.load %arg5[%c0_14, %c0_15] : memref<16x128xf32, #tpu.memory_space<vmem>>, vector<16x128xf32>
      tpu.vector_store %arg5[%c0_14, %c0_15], %26 {strides = array<i32>} : memref<16x128xf32, #tpu.memory_space<vmem>>, vector<16x128xf32>,
    } else {
    }
    %c0 = arith.constant 0 : index
    %c0_1 = arith.constant 0 : index
    %3 = vector.load %arg2[%c0, %c0_1] : memref<16x128xf32, #tpu.memory_space<vmem>>, vector<16x128xf32>
    %c0_2 = arith.constant 0 : index
    %c0_3 = arith.constant 0 : index
    %4 = vector.load %arg3[%c0_2, %c0_3] : memref<16x128xbf16, #tpu.memory_space<vmem>>, vector<16x128xbf16>
    %5 = arith.extf %4 : vector<16x128xbf16> to vector<16x128xf32>
    %cst = arith.constant 1.000000e-01 : f32
    %cst_4 = arith.constant 0.899999976 : f32
    %6 = vector.broadcast %cst : f32 to vector<16x128xf32>
    %7 = arith.maximumf %6, %5 : vector<16x128xf32>
    %8 = vector.broadcast %cst_4 : f32 to vector<16x128xf32>
    %9 = arith.minimumf %8, %7 : vector<16x128xf32>
    %cst_5 = arith.constant 0.000000e+00 : f32
    %10 = vector.broadcast %cst_5 : f32 to vector<16x128xf32>
    %11 = arith.maximumf %3, %10 : vector<16x128xf32>
    %12 = arith.mulf %3, %9 : vector<16x128xf32>
    %13 = arith.subf %11, %12 : vector<16x128xf32>
    %14 = math.absf %3 : vector<16x128xf32>
    %cst_6 = arith.constant 0.000000e+00 : f32
    %15 = vector.broadcast %cst_6 : f32 to vector<16x128xf32>
    %16 = arith.subf %15, %14 : vector<16x128xf32>
    %17 = math.exp %16 : vector<16x128xf32>
    %18 = math.log1p %17 : vector<16x128xf32>
    %19 = arith.addf %13, %18 : vector<16x128xf32>
    %c0_7 = arith.constant 0 : index
    %c0_8 = arith.constant 0 : index
    %20 = vector.load %arg5[%c0_7, %c0_8] : memref<16x128xf32, #tpu.memory_space<vmem>>, vector<16x128xf32>
    %21 = arith.addf %20, %19 : vector<16x128xf32>
    %c0_9 = arith.constant 0 : index
    %c0_10 = arith.constant 0 : index
    %22 = vector.load %arg5[%c0_9, %c0_10] : memref<16x128xf32, #tpu.memory_space<vmem>>, vector<16x128xf32>
    tpu.vector_store %arg5[%c0_9, %c0_10], %21 {strides = array<i32>} : memref<16x128xf32, #tpu.memory_space<vmem>>, vector<16x128xf32>,
    %c0_i32_11 = arith.constant 0 : i32
    %23 = arith.cmpi eq, %arg1, %c0_i32_11 : i32
    %24 = arith.extui %23 : i1 to i32
    %c0_i32_12 = arith.constant 0 : i32
    %25 = arith.cmpi ne, %24, %c0_i32_12 : i32
    scf.if %25 {
      %c0_13 = arith.constant 0 : index
      %c0_14 = arith.constant 0 : index
      %26 = vector.load %arg5[%c0_13, %c0_14] : memref<16x128xf32, #tpu.memory_space<vmem>>, vector<16x128xf32>
      %27 = vector.shape_cast %26 : vector<16x128xf32> to vector<1x16x128xf32>
      %cst_15 = arith.constant dense<0.000000e+00> : vector<1xf32>
      %28 = vector.multi_reduction <add>, %27, %cst_15 [1, 2] : vector<1x16x128xf32> to vector<1xf32>
      %29 = vector.shape_cast %28 : vector<1xf32> to vector<1x1x1xf32>
      %30 = vector.extract %29[0, 0, 0] : f32 from vector<1x1x1xf32>
      %c0_16 = arith.constant 0 : index
      %c0_17 = arith.constant 0 : index
      %31 = memref.load %arg4[%c0_16, %c0_17] : memref<1x1xf32, #tpu.memory_space<smem>>
      memref.store %30, %arg4[%c0_16, %c0_17] : memref<1x1xf32, #tpu.memory_space<smem>>
    } else {
    }
    return
  }
  func.func @transform_0(%arg0: i32, %arg1: i32) -> (i32, i32) {
    %c1_i32 = arith.constant 1 : i32
    %0 = arith.muli %arg0, %c1_i32 : i32
    %1 = arith.addi %0, %arg1 : i32
    %c0_i32 = arith.constant 0 : i32
    %2 = arith.minsi %1, %c0_i32 : i32
    %c0_i32_0 = arith.constant 0 : i32
    %c0_i32_1 = arith.constant 0 : i32
    return %2, %c0_i32_0 : i32, i32
  }
  func.func @transform_1(%arg0: i32, %arg1: i32) -> (i32, i32) {
    %c1_i32 = arith.constant 1 : i32
    %0 = arith.muli %arg0, %c1_i32 : i32
    %1 = arith.addi %0, %arg1 : i32
    %c0_i32 = arith.constant 0 : i32
    %2 = arith.minsi %1, %c0_i32 : i32
    %c0_i32_0 = arith.constant 0 : i32
    %c0_i32_1 = arith.constant 0 : i32
    return %2, %c0_i32_0 : i32, i32
  }
  func.func @transform_2(%arg0: i32, %arg1: i32) -> (i32, i32) {
    %c0_i32 = arith.constant 0 : i32
    %c0_i32_0 = arith.constant 0 : i32
    return %arg0, %c0_i32 : i32, i32
  }
}

</mosaic_0001>

<bundles_post_ra>
// kernel: tpu_custom_call.1
= control target key start
LH: loop header
LB: loop body
LE: loop exit
PB: predicated region body
PF: predicated region fallthrough
CT: control target
= control target key end

     0   :  { %7 = vsyncpa [#allocation4], 0  ;;  %s276_s0 = inlined_call_operand.hbm [shape: f32[16,128], index: 0, kind: input, shape index: {}]   ;;  %s277_s1 = inlined_call_operand.hbm [shape: bf16[16,128], index: 1, kind: input, shape index: {}]   ;;  %s278_s2 = inlined_call_operand.hbm [shape: f32[1,1], index: 2, kind: output, shape index: {}]  }
   0x1   :  { %8 = vsyncpa [#allocation7], 0 }
   0x2   :  { %9 = vsyncpa [#allocation5], 0  ;;  %s20_s11 = sshll.u32 %s276_s0, 4  ;;  %s245_s12 = smov [#allocation3]   ;;  %s21_s11 = int_to_ptr.hbm [resolvable:$true] %s20_s11 }
   0x3   :  { %s22_s13 = sshll.u32 %s245_s12, 4  ;;  %s39_s16 = sshll.u32 %s277_s1, 4  ;;  %s23_s13 = int_to_ptr.vmem [resolvable:$true] %s22_s13  ;;  %s40_s16 = int_to_ptr.hbm [resolvable:$true] %s39_s16 }
   0x4   :  { %s246_s17 = smov 128   ;;  %s247_s18 = smov 8  }
   0x5   :  { %28 = dma.hbm_to_vmem [thread:$0]  %s21_s11, 256, %s23_s13, [#allocation4], %s246_s17, %s246_s17, %s247_s18  }
   0x6   :  { %s248_s19 = smov [#allocation6]   ;;  %s249_s21 = smov 64  }
   0x7   :  { %s41_s20 = sshll.u32 %s248_s19, 4  ;;  %s250_s22 = smov 4   ;;  %s42_s20 = int_to_ptr.vmem [resolvable:$true] %s41_s20 }
   0x8   :  { %47 = dma.hbm_to_vmem [thread:$0]  %s40_s16, 128, %s42_s20, [#allocation7], %s249_s21, %s249_s21, %s250_s22  }
   0x9   :  { %239 = dma.done.wait [#allocation4], 256  }
   0xa   :  { %240 = vsyncadd [#allocation4], 4294967040 }
   0xb   :  { %241 = dma.done.wait [#allocation7], 128  }
   0xc   :  { %242 = vsyncadd [#allocation7], 4294967168  ;;  %v70_v0 = vld [vmem:[#allocation3] sm:$0xff]  ;;  %v71_v1 = vld [vmem:[#allocation3 + $0x8] sm:$0xff]  ;;  %s142_s23 = sshll.u32 %s278_s2, 4  ;;  %s251_s25 = smov [#allocation8]   ;;  %s143_s23 = int_to_ptr.hbm [resolvable:$true] %s142_s23 }
   0xd   :  { %v86_v2 = vand.u32 2147483647, %v70_v0  ;;  %v87_v3 = vand.u32 2147483647, %v71_v1  ;;  %v159_v4 = vld [vmem:[#allocation6] sm:$0xff]   ;;  %v80_v22 = vmax.f32 %v70_v0, 0.0 }
   0xe   :  { %v160_v9 = vunpack.c.l.bf16 %v159_v4  ;;  %v161_v10 = vunpack.c.h.bf16 %v159_v4  ;;  %v81_v26 = vmax.f32 %v71_v1, 0.0 }
   0xf   :  { %v88_v5 = vsub.f32 0.0, %v86_v2  ;;  %v89_v6 = vsub.f32 0.0, %v87_v3 }
  0x10   :  { %v76_v11 = vmax.f32 %v160_v9, 0.1  ;;  %v77_v12 = vmax.f32 %v161_v10, 0.1 }
  0x11   :  { %v90_v7 = vmul.f32 1.442695, %v88_v5  ;;  %v92_v8 = vmul.f32 1.442695, %v89_v6 }
  0x12   :  { %v78_v15 = vmin.f32 %v76_v11, 0.9  ;;  %v79_v18 = vmin.f32 %v77_v12, 0.9 }
  0x13   :  { %171 = vpow2.f32 %v90_v7 }
  0x14   :  { %173 = vpow2.f32 %v92_v8  ;;  %v82_v23 = vmul.f32 %v78_v15, %v70_v0  ;;  %v83_v27 = vmul.f32 %v79_v18, %v71_v1 }
  0x16   :  { %v84_v31 = vsub.f32 %v80_v22, %v82_v23  ;;  %v85_v34 = vsub.f32 %v81_v26, %v83_v27 }
  0x19   :  { %v172_v13 = vpop.eup %171 }
  0x1a   :  { %v174_v14 = vpop.eup %173  ;;  %v94_v16 = vadd.f32 1.0, %v172_v13  ;;  %v97_v17 = vmul.f32 -0.5, %v172_v13  ;;  %v100_v24 = vand.u32 2147483647, %v172_v13 }
  0x1b   :  { %v103_v19 = vadd.f32 1.0, %v174_v14  ;;  %v106_v20 = vmul.f32 -0.5, %v174_v14  ;;  %v109_v28 = vand.u32 2147483647, %v174_v14 }
  0x1c   :  { %175 = vlog2.f32 %v94_v16  ;;  %v98_v21 = vadd.f32 1.0, %v97_v17  ;;  %vm101_vm0 = vcmp.lt.f32.partialorder %v100_v24, 0.0004427343 }
  0x1d   :  { %177 = vlog2.f32 %v103_v19  ;;  %v107_v25 = vadd.f32 1.0, %v106_v20  ;;  %vm110_vm1 = vcmp.lt.f32.partialorder %v109_v28, 0.0004427343 }
  0x1e   :  { %v99_v29 = vmul.f32 %v172_v13, %v98_v21 }
  0x1f   :  { %v108_v32 = vmul.f32 %v174_v14, %v107_v25 }
  0x22   :  { %v176_v30 = vpop.eup %175 }
  0x23   :  { %v178_v33 = vpop.eup %177  ;;  %v96_v35 = vmul.f32 0.6931472, %v176_v30 }
  0x24   :  { %v105_v36 = vmul.f32 0.6931472, %v178_v33 }
  0x25   :  { %v102_v37 = vsel %vm101_vm0, %v99_v29, %v96_v35 }
  0x26   :  { %v111_v38 = vsel %vm110_vm1, %v108_v32, %v105_v36  ;;  %v112_v39 = vadd.f32 %v102_v37, %v84_v31 }
  0x27   :  { %v113_v40 = vadd.f32 %v111_v38, %v85_v34 }
  0x29   :  { %v125_v41 = vadd.f32 %v113_v40, %v112_v39 }
  0x2b   :  { %126 = vadd.xlane.f32.xlu0 %v125_v41 }
  0x9e   :  { %v127_v42 = vpop.xlane.xlu0 %126 }
  0x9f   :  { %v128_v43 = vrot.slane %v127_v42, 4 }
  0xa1   :  { %v129_v44 = vadd.f32 %v128_v43, %v127_v42 }
  0xa3   :  { %v130_v45 = vrot.slane %v129_v44, 2 }
  0xa5   :  { %v131_v46 = vadd.f32 %v130_v45, %v129_v44 }
  0xa7   :  { %v132_v47 = vrot.slane %v131_v46, 1 }
  0xa9   :  { %v133_v48 = vadd.f32 %v132_v47, %v131_v46 }
  0xab   :  { %162 = vpush %v133_v48 }
  0xdc   :  { %s163_s24 = spop %162 }
  0xdd   :  { %136 = sst [smem:[#allocation8]] %s163_s24 }
  0xde   :  { %145 = dma.smem_to_hbm %s251_s25, 16, %s143_s23, [#allocation5]  }
  0xdf   :  { %243 = dma.done.wait [#allocation5], 16  }
  0xe0   :  { %244 = vsyncadd [#allocation5], 4294967280 }
  0xe1   :  { %150 = sfence }
  0xe2   :  { %151 = vsyncpa [#allocation4], 1 }
  0xe3   :  { %152 = vsyncpa [#allocation7], 1 }
  0xe4   :  { %153 = vsyncpa [#allocation5], 1 }

</bundles_post_ra>
